<compile_context>
chip_gen: v6e
topology: v6e:2x2x1
jax: 0.10.0
libtpu: 0.0.40
codegen_flags: <defaults>
</compile_context>

<pallas_src>
from functools import partial

import jax
import jax.numpy as jnp
from jax.experimental import pallas as pl
from jax.experimental.pallas import tpu as pltpu

_LN_EPS = 1e-5


def _erf_approx(x):
    # TODO(synk): exact erf (lax.erf) may lack a Mosaic lowering; use the
    # Abramowitz & Stegun 7.1.26 rational approximation (|err| < 1.5e-7).
    p = 0.3275911
    a1, a2, a3, a4, a5 = (0.254829592, -0.284496736, 1.421413741,
                          -1.453152027, 1.061405429)
    ax = jnp.abs(x)
    t = 1.0 / (1.0 + p * ax)
    poly = ((((a5 * t + a4) * t + a3) * t + a2) * t + a1) * t
    y = 1.0 - poly * jnp.exp(-ax * ax)
    return jnp.where(x >= 0, y, -y)


def _gelu_exact(x):
    # nn.GELU default = exact (erf) gelu
    return 0.5 * x * (1.0 + _erf_approx(x * 0.7071067811865476))


def _layernorm(x, w, b):
    mu = jnp.mean(x, axis=-1, keepdims=True)
    xc = x - mu
    var = jnp.mean(xc * xc, axis=-1, keepdims=True)
    return xc * jax.lax.rsqrt(var + _LN_EPS) * w + b


def _block_kernel(x_ref, pvec_ref, b1_ref,
                  wqkv_ref, wp_ref, w1_ref, w2_ref,
                  o_ref, attn_acc_ref, *, num_heads, scale, n_valid):
    _, N, C = x_ref.shape
    hd = C // num_heads
    bf16 = jnp.bfloat16

    # Packed per-channel params (one (8, C) array -> row slices).
    ln1w, ln1b = pvec_ref[0], pvec_ref[1]
    bp,   g1   = pvec_ref[2], pvec_ref[3]
    ln2w, ln2b = pvec_ref[4], pvec_ref[5]
    b2,   g2   = pvec_ref[6], pvec_ref[7]

    x = x_ref[0].astype(jnp.float32)                      # (N, C) residual stream, f32

    # ---------------- attention branch ----------------
    xn = _layernorm(x, ln1w, ln1b)                        # (N, C) f32

    # Fused QKV projection: one full-width MXU matmul, bf16 operands / f32 acc.
    qkv = jnp.dot(xn.astype(bf16), wqkv_ref[...],
                  preferred_element_type=jnp.float32)     # (N, 3C) f32

    # Hoist slices / casts out of the head loop.  K stays in its natural
    # (N, hd) layout; dot_general below contracts the last axes (no transpose).
    q_b = (qkv[:, 0:C] * scale).astype(bf16)              # (N, C)
    k_b = qkv[:, C:2 * C].astype(bf16)                    # (N, C)
    v_b = qkv[:, 2 * C:3 * C].astype(bf16)                # (N, C)

    if n_valid < N:                                       # static: only when padded
        key_valid = jax.lax.broadcasted_iota(jnp.int32, (N, N), 1) < n_valid
    else:
        key_valid = None

    # TODO(synk): for num_heads > ~16 convert to lax.fori_loop(..., unroll=True)
    #             over a head index to bound compile-time unrolling.
    for h in range(num_heads):                            # static unroll; tiny body
        sl = slice(h * hd, (h + 1) * hd)
        # scores = q_h @ k_h^T without materializing a transpose.
        s = jax.lax.dot_general(q_b[:, sl], k_b[:, sl],
                                (((1,), (1,)), ((), ())),
                                preferred_element_type=jnp.float32)   # (N, N) f32
        if key_valid is not None:
            s = jnp.where(key_valid, s, -1e30)            # mask padded key columns
        s = s - jnp.max(s, axis=-1, keepdims=True)
        e = jnp.exp(s)
        pattn = e * pl.reciprocal(jnp.sum(e, axis=-1, keepdims=True), approx=True)
        # Write head output at its static lane offset (no concatenate/relayout).
        attn_acc_ref[:, sl] = jnp.dot(pattn.astype(bf16), v_b[:, sl],
                                      preferred_element_type=jnp.float32)

    # Single fused output projection (N,C)x(C,C).
    attn_out = jnp.dot(attn_acc_ref[...].astype(bf16), wp_ref[...],
                       preferred_element_type=jnp.float32) + bp

    x = x + g1 * attn_out                                 # residual + layer-scale (f32)

    # ---------------- MLP branch ----------------
    xn2 = _layernorm(x, ln2w, ln2b)
    h1 = jnp.dot(xn2.astype(bf16), w1_ref[...],
                 preferred_element_type=jnp.float32) + b1_ref[0]
    h1 = _gelu_exact(h1)
    y = jnp.dot(h1.astype(bf16), w2_ref[...],
                preferred_element_type=jnp.float32) + b2

    x = x + g2 * y                                        # residual + layer-scale (f32)
    o_ref[0] = x.astype(o_ref.dtype)


def _rep_spec(arr, single_buffer):
    """Full-array replicated BlockSpec (constant index map)."""
    idx = lambda b, _nd=arr.ndim: (0,) * _nd
    if single_buffer:
        # Constant index map => double-buffering is pure VMEM waste on v7x.
        return pl.BlockSpec(arr.shape, idx, pipeline_mode=pl.Buffered(1))
    return pl.BlockSpec(arr.shape, idx)


def _vmem_capacity_bytes():
    try:
        return int(pltpu.get_tpu_info().vmem_capacity_bytes)
    except Exception:
        return 128 << 20                                   # v5e/v6e default


def _vmem_limit_bytes(N, C, hidden, vmem_capacity):
    # bf16 weights (x2 buffering margin) + f32 activation working set, with slack,
    # capped chip-aware: ~51 MiB on v7x (64 MiB phys), <=100 MiB on v5e/v6e.
    w = 2 * (3 * C * C + C * C + 2 * C * hidden)
    a = 4 * (8 * N * C + 2 * N * hidden + 2 * N * N)
    est = 2 * w + 4 * a + (4 << 20)
    cap = min(int(vmem_capacity * 0.80), 100 << 20)
    return int(min(max(est, 32 << 20), cap))


def _round_up(n, m):
    return ((n + m - 1) // m) * m


@partial(jax.jit, static_argnames=("num_heads", "n_valid", "single_buffer", "vmem_limit"))
def _layer_scale_block_impl(x, pvec, b1, wqkv, wp, w1, w2,
                            num_heads, n_valid, single_buffer, vmem_limit):
    B, N, C = x.shape
    hd = C // num_heads
    scale = hd ** (-0.5)                                   # qk_scale=None default

    in_specs = [pl.BlockSpec((1, N, C), lambda b: (b, 0, 0)),
                _rep_spec(pvec, False),
                _rep_spec(b1, False),
                _rep_spec(wqkv, single_buffer),
                _rep_spec(wp, single_buffer),
                _rep_spec(w1, single_buffer),
                _rep_spec(w2, single_buffer)]

    kernel = partial(_block_kernel, num_heads=num_heads, scale=scale, n_valid=n_valid)
    return pl.pallas_call(
        kernel,
        out_shape=jax.ShapeDtypeStruct((B, N, C), x.dtype),
        grid_spec=pltpu.PrefetchScalarGridSpec(
            num_scalar_prefetch=0,
            grid=(B,),
            in_specs=in_specs,
            out_specs=pl.BlockSpec((1, N, C), lambda b: (b, 0, 0)),
            scratch_shapes=[pltpu.VMEM((N, C), jnp.float32)]),
        compiler_params=pltpu.CompilerParams(
            dimension_semantics=("parallel",),
            vmem_limit_bytes=vmem_limit),
    )(x, pvec, b1, wqkv, wp, w1, w2)


def layer_scale_block(x, params, num_heads):
    """Fused LayerScale transformer block (forward only)."""
    B, N, C = x.shape
    hidden = params["w1"].shape[-1]

    # Pad token count so every matmul / softmax tile is aligned; pad key columns
    # are masked inside the kernel and pad rows stripped on output.
    pad_to = 128 if N >= 128 else 8
    N_pad = _round_up(N, pad_to)
    xp = x if N_pad == N else jnp.pad(x, ((0, 0), (0, N_pad - N), (0, 0)))

    # Chip-aware VMEM budget + buffering (single-buffer weights only on v7x).
    vmem_cap = _vmem_capacity_bytes()
    single_buffer = vmem_cap < (100 << 20)
    vmem_limit = _vmem_limit_bytes(N_pad, C, hidden, vmem_cap)

    # Big weight matrices in bf16 (halves DMA/VMEM, MXU-native); the eight tiny
    # (1, C) per-channel params are packed into one (8, C) f32 array.
    bf16 = jnp.bfloat16
    wqkv = params["wqkv"].astype(bf16)
    wp = params["wp"].astype(bf16)
    w1 = params["w1"].astype(bf16)
    w2 = params["w2"].astype(bf16)
    pvec = jnp.concatenate(
        [params[k] for k in ("ln1_w", "ln1_b", "bp", "g1",
                             "ln2_w", "ln2_b", "b2", "g2")],
        axis=0).astype(jnp.float32)
    b1 = params["b1"].astype(jnp.float32)

    out = _layer_scale_block_impl(xp, pvec, b1, wqkv, wp, w1, w2,
                                  num_heads=num_heads, n_valid=N,
                                  single_buffer=single_buffer,
                                  vmem_limit=vmem_limit)
    return out if N_pad == N else out[:, :N, :]


def make_params(key, dim, num_heads, mlp_ratio=4.0, init_values=1e-4):
    hidden = int(dim * mlp_ratio)
    ks = jax.random.split(key, 7)
    f32 = jnp.float32
    return {
        "ln1_w": jnp.ones((1, dim), f32),
        "ln1_b": jnp.zeros((1, dim), f32),
        "wqkv": 0.02 * jax.random.normal(ks[0], (dim, 3 * dim), f32),  # no qkv bias
        "wp": 0.02 * jax.random.normal(ks[1], (dim, dim), f32),
        "bp": 0.02 * jax.random.normal(ks[2], (1, dim), f32),
        "g1": init_values * jnp.ones((1, dim), f32),
        "ln2_w": jnp.ones((1, dim), f32),
        "ln2_b": jnp.zeros((1, dim), f32),
        "w1": 0.02 * jax.random.normal(ks[3], (dim, hidden), f32),
        "b1": 0.02 * jax.random.normal(ks[4], (1, hidden), f32),
        "w2": 0.02 * jax.random.normal(ks[5], (hidden, dim), f32),
        "b2": 0.02 * jax.random.normal(ks[6], (1, dim), f32),
        "g2": init_values * jnp.ones((1, dim), f32),
    }


def reference(x, params, num_heads):
    """Pure-JAX f32 reference matching the PyTorch forward."""
    def ln(v, w, b):
        mu = jnp.mean(v, -1, keepdims=True)
        var = jnp.mean((v - mu) ** 2, -1, keepdims=True)
        return (v - mu) / jnp.sqrt(var + _LN_EPS) * w.reshape(-1) + b.reshape(-1)

    B, N, C = x.shape
    hd = C // num_heads
    scale = hd ** (-0.5)

    xn = ln(x, params["ln1_w"], params["ln1_b"])
    qkv = (xn @ params["wqkv"]).reshape(B, N, 3, num_heads, hd).transpose(2, 0, 3, 1, 4)
    q, k, v = qkv[0] * scale, qkv[1], qkv[2]
    attn = jax.nn.softmax(jnp.einsum("bhqd,bhkd->bhqk", q, k), axis=-1)
    o = jnp.einsum("bhqk,bhkd->bhqd", attn, v).transpose(0, 2, 1, 3).reshape(B, N, C)
    proj = o @ params["wp"] + params["bp"].reshape(-1)
    x = x + params["g1"].reshape(-1) * proj

    xn2 = ln(x, params["ln2_w"], params["ln2_b"])
    h = jax.nn.gelu(xn2 @ params["w1"] + params["b1"].reshape(-1), approximate=False)
    y = h @ params["w2"] + params["b2"].reshape(-1)
    return x + params["g2"].reshape(-1) * y


if __name__ == "__main__":
    key = jax.random.PRNGKey(0)
    kx, kp = jax.random.split(key)

    # batch, tokens, dim, heads (head_dim=8, mlp hidden=128)
    B, N, C, H = 2, 8, 32, 4
    params = make_params(kp, C, H)

    # Case 1: aligned token count (no padding / masking path).
    x = jax.random.normal(kx, (B, N, C), jnp.float32)
    out = jax.block_until_ready(layer_scale_block(x, params, num_heads=H))
    ref = reference(x, params, H)
    err = float(jnp.max(jnp.abs(out - ref)))
    assert out.shape == (B, N, C) and out.dtype == jnp.float32
    assert err < 2e-3, f"aligned-case max abs err {err}"

    # Case 2: ragged token count (exercises the pad-to-8 + key-mask path: 12 -> 16).
    N2 = 12
    x2 = jax.random.normal(jax.random.fold_in(kx, 1), (B, N2, C), jnp.float32)
    out2 = jax.block_until_ready(layer_scale_block(x2, params, num_heads=H))
    ref2 = reference(x2, params, H)
    err2 = float(jnp.max(jnp.abs(out2 - ref2)))
    assert out2.shape == (B, N2, C) and out2.dtype == jnp.float32
    assert err2 < 2e-3, f"ragged-case max abs err {err2}"

    print("KERNEL_OK")
</pallas_src>

<mosaic_0001>
module attributes {stable_mosaic.version = 11 : i64} {
  func.func @_block_kernel(%arg0: i32, %arg1: memref<1x8x32xf32, #tpu.memory_space<vmem>>, %arg2: memref<8x32xf32, #tpu.memory_space<vmem>>, %arg3: memref<1x128xf32, #tpu.memory_space<vmem>>, %arg4: memref<32x96xbf16, #tpu.memory_space<vmem>>, %arg5: memref<32x32xbf16, #tpu.memory_space<vmem>>, %arg6: memref<32x128xbf16, #tpu.memory_space<vmem>>, %arg7: memref<128x32xbf16, #tpu.memory_space<vmem>>, %arg8: memref<1x8x32xf32, #tpu.memory_space<vmem>>, %arg9: memref<8x32xf32, #tpu.memory_space<vmem>>) attributes {dimension_semantics = [#tpu.dimension_semantics<parallel>], iteration_bounds = array<i64: 2>, scalar_prefetch = 0 : i64, scratch_operands = 1 : i64, tpu.core_type = #tpu.core_type<tc>, window_params = [{transform_indices = @transform_0, window_bounds = array<i64: 1, 8, 32>}, {pipeline_mode = #tpu.pipeline_mode<synchronous>, transform_indices = @transform_1, window_bounds = array<i64: 8, 32>}, {pipeline_mode = #tpu.pipeline_mode<synchronous>, transform_indices = @transform_2, window_bounds = array<i64: 1, 128>}, {pipeline_mode = #tpu.pipeline_mode<synchronous>, transform_indices = @transform_3, window_bounds = array<i64: 32, 96>}, {pipeline_mode = #tpu.pipeline_mode<synchronous>, transform_indices = @transform_4, window_bounds = array<i64: 32, 32>}, {pipeline_mode = #tpu.pipeline_mode<synchronous>, transform_indices = @transform_5, window_bounds = array<i64: 32, 128>}, {pipeline_mode = #tpu.pipeline_mode<synchronous>, transform_indices = @transform_6, window_bounds = array<i64: 128, 32>}, {transform_indices = @transform_7, window_bounds = array<i64: 1, 8, 32>}]} {
    %c0 = arith.constant 0 : index
    %c0_0 = arith.constant 0 : index
    %0 = vector.load %arg2[%c0, %c0_0] : memref<8x32xf32, #tpu.memory_space<vmem>>, vector<1x32xf32>
    %1 = vector.shape_cast %0 : vector<1x32xf32> to vector<32xf32>
    %c1 = arith.constant 1 : index
    %c0_1 = arith.constant 0 : index
    %2 = vector.load %arg2[%c1, %c0_1] : memref<8x32xf32, #tpu.memory_space<vmem>>, vector<1x32xf32>
    %3 = vector.shape_cast %2 : vector<1x32xf32> to vector<32xf32>
    %c2 = arith.constant 2 : index
    %c0_2 = arith.constant 0 : index
    %4 = vector.load %arg2[%c2, %c0_2] : memref<8x32xf32, #tpu.memory_space<vmem>>, vector<1x32xf32>
    %5 = vector.shape_cast %4 : vector<1x32xf32> to vector<32xf32>
    %c3 = arith.constant 3 : index
    %c0_3 = arith.constant 0 : index
    %6 = vector.load %arg2[%c3, %c0_3] : memref<8x32xf32, #tpu.memory_space<vmem>>, vector<1x32xf32>
    %7 = vector.shape_cast %6 : vector<1x32xf32> to vector<32xf32>
    %c4 = arith.constant 4 : index
    %c0_4 = arith.constant 0 : index
    %8 = vector.load %arg2[%c4, %c0_4] : memref<8x32xf32, #tpu.memory_space<vmem>>, vector<1x32xf32>
    %9 = vector.shape_cast %8 : vector<1x32xf32> to vector<32xf32>
    %c5 = arith.constant 5 : index
    %c0_5 = arith.constant 0 : index
    %10 = vector.load %arg2[%c5, %c0_5] : memref<8x32xf32, #tpu.memory_space<vmem>>, vector<1x32xf32>
    %11 = vector.shape_cast %10 : vector<1x32xf32> to vector<32xf32>
    %c6 = arith.constant 6 : index
    %c0_6 = arith.constant 0 : index
    %12 = vector.load %arg2[%c6, %c0_6] : memref<8x32xf32, #tpu.memory_space<vmem>>, vector<1x32xf32>
    %13 = vector.shape_cast %12 : vector<1x32xf32> to vector<32xf32>
    %c7 = arith.constant 7 : index
    %c0_7 = arith.constant 0 : index
    %14 = vector.load %arg2[%c7, %c0_7] : memref<8x32xf32, #tpu.memory_space<vmem>>, vector<1x32xf32>
    %15 = vector.shape_cast %14 : vector<1x32xf32> to vector<32xf32>
    %c0_8 = arith.constant 0 : index
    %c0_9 = arith.constant 0 : index
    %c0_10 = arith.constant 0 : index
    %16 = vector.load %arg1[%c0_8, %c0_9, %c0_10] : memref<1x8x32xf32, #tpu.memory_space<vmem>>, vector<1x8x32xf32>
    %17 = vector.shape_cast %16 : vector<1x8x32xf32> to vector<8x32xf32>
    %cst = arith.constant dense<0.000000e+00> : vector<8xf32>
    %18 = vector.multi_reduction <add>, %17, %cst [1] : vector<8x32xf32> to vector<8xf32>
    %19 = vector.shape_cast %18 : vector<8xf32> to vector<8x1xf32>
    %cst_11 = arith.constant 3.200000e+01 : f32
    %20 = vector.broadcast %cst_11 : f32 to vector<8x1xf32>
    %21 = arith.divf %19, %20 : vector<8x1xf32>
    %22 = vector.broadcast %21 : vector<8x1xf32> to vector<8x32xf32>
    %23 = arith.subf %17, %22 : vector<8x32xf32>
    %24 = arith.mulf %23, %23 : vector<8x32xf32>
    %cst_12 = arith.constant dense<0.000000e+00> : vector<8xf32>
    %25 = vector.multi_reduction <add>, %24, %cst_12 [1] : vector<8x32xf32> to vector<8xf32>
    %26 = vector.shape_cast %25 : vector<8xf32> to vector<8x1xf32>
    %cst_13 = arith.constant 3.200000e+01 : f32
    %27 = vector.broadcast %cst_13 : f32 to vector<8x1xf32>
    %28 = arith.divf %26, %27 : vector<8x1xf32>
    %cst_14 = arith.constant 9.99999974E-6 : f32
    %29 = vector.broadcast %cst_14 : f32 to vector<8x1xf32>
    %30 = arith.addf %28, %29 : vector<8x1xf32>
    %31 = math.rsqrt %30 : vector<8x1xf32>
    %32 = vector.broadcast %31 : vector<8x1xf32> to vector<8x32xf32>
    %33 = arith.mulf %23, %32 : vector<8x32xf32>
    %34 = vector.shape_cast %1 : vector<32xf32> to vector<1x32xf32>
    %35 = vector.broadcast %34 : vector<1x32xf32> to vector<8x32xf32>
    %36 = arith.mulf %33, %35 : vector<8x32xf32>
    %37 = vector.shape_cast %3 : vector<32xf32> to vector<1x32xf32>
    %38 = vector.broadcast %37 : vector<1x32xf32> to vector<8x32xf32>
    %39 = arith.addf %36, %38 : vector<8x32xf32>
    %40 = arith.truncf %39 : vector<8x32xf32> to vector<8x32xbf16>
    %c0_15 = arith.constant 0 : index
    %c0_16 = arith.constant 0 : index
    %41 = vector.load %arg4[%c0_15, %c0_16] : memref<32x96xbf16, #tpu.memory_space<vmem>>, vector<32x96xbf16>
    %cst_17 = arith.constant dense<0.000000e+00> : vector<8x96xf32>
    %42 = tpu.matmul %40, %41, %cst_17 {dimension_numbers = #tpu.dot_dimension_numbers<[1], [0], [0], [1], [0, 0, 1, 1], [], []>} : vector<8x32xbf16>, vector<32x96xbf16>, vector<8x96xf32> -> vector<8x96xf32>
    %43 = vector.extract_strided_slice %42 {offsets = [0, 0], sizes = [8, 32], strides = [1, 1]} : vector<8x96xf32> to vector<8x32xf32>
    %cst_18 = arith.constant 0.353553385 : f32
    %44 = vector.broadcast %cst_18 : f32 to vector<8x32xf32>
    %45 = arith.mulf %43, %44 : vector<8x32xf32>
    %46 = arith.truncf %45 : vector<8x32xf32> to vector<8x32xbf16>
    %47 = vector.extract_strided_slice %42 {offsets = [0, 32], sizes = [8, 32], strides = [1, 1]} : vector<8x96xf32> to vector<8x32xf32>
    %48 = arith.truncf %47 : vector<8x32xf32> to vector<8x32xbf16>
    %49 = vector.extract_strided_slice %42 {offsets = [0, 64], sizes = [8, 32], strides = [1, 1]} : vector<8x96xf32> to vector<8x32xf32>
    %50 = arith.truncf %49 : vector<8x32xf32> to vector<8x32xbf16>
    %51 = vector.extract_strided_slice %46 {offsets = [0, 0], sizes = [8, 8], strides = [1, 1]} : vector<8x32xbf16> to vector<8x8xbf16>
    %52 = vector.extract_strided_slice %48 {offsets = [0, 0], sizes = [8, 8], strides = [1, 1]} : vector<8x32xbf16> to vector<8x8xbf16>
    %cst_19 = arith.constant dense<0.000000e+00> : vector<8x8xf32>
    %53 = tpu.matmul %51, %52, %cst_19 {dimension_numbers = #tpu.dot_dimension_numbers<[1], [1], [0], [0], [0, 0, 1, 0], [], []>} : vector<8x8xbf16>, vector<8x8xbf16>, vector<8x8xf32> -> vector<8x8xf32>
    %cst_20 = arith.constant dense<0xFF800000> : vector<8xf32>
    %54 = vector.multi_reduction <maximumf>, %53, %cst_20 [1] : vector<8x8xf32> to vector<8xf32>
    %55 = vector.shape_cast %54 : vector<8xf32> to vector<8x1xf32>
    %56 = vector.broadcast %55 : vector<8x1xf32> to vector<8x8xf32>
    %57 = arith.subf %53, %56 : vector<8x8xf32>
    %58 = math.exp %57 : vector<8x8xf32>
    %cst_21 = arith.constant dense<0.000000e+00> : vector<8xf32>
    %59 = vector.multi_reduction <add>, %58, %cst_21 [1] : vector<8x8xf32> to vector<8xf32>
    %60 = vector.shape_cast %59 : vector<8xf32> to vector<8x1xf32>
    %61 = tpu.reciprocal %60 {approx = true} : vector<8x1xf32> -> vector<8x1xf32>
    %62 = vector.broadcast %61 : vector<8x1xf32> to vector<8x8xf32>
    %63 = arith.mulf %58, %62 : vector<8x8xf32>
    %64 = arith.truncf %63 : vector<8x8xf32> to vector<8x8xbf16>
    %65 = vector.extract_strided_slice %50 {offsets = [0, 0], sizes = [8, 8], strides = [1, 1]} : vector<8x32xbf16> to vector<8x8xbf16>
    %cst_22 = arith.constant dense<0.000000e+00> : vector<8x8xf32>
    %66 = tpu.matmul %64, %65, %cst_22 {dimension_numbers = #tpu.dot_dimension_numbers<[1], [0], [0], [1], [0, 0, 1, 1], [], []>} : vector<8x8xbf16>, vector<8x8xbf16>, vector<8x8xf32> -> vector<8x8xf32>
    %c0_23 = arith.constant 0 : index
    %c0_24 = arith.constant 0 : index
    %67 = vector.load %arg9[%c0_23, %c0_24] : memref<8x32xf32, #tpu.memory_space<vmem>>, vector<8x8xf32>
    tpu.vector_store %arg9[%c0_23, %c0_24], %66 {strides = array<i32>} : memref<8x32xf32, #tpu.memory_space<vmem>>, vector<8x8xf32>,
    %68 = vector.extract_strided_slice %46 {offsets = [0, 8], sizes = [8, 8], strides = [1, 1]} : vector<8x32xbf16> to vector<8x8xbf16>
    %69 = vector.extract_strided_slice %48 {offsets = [0, 8], sizes = [8, 8], strides = [1, 1]} : vector<8x32xbf16> to vector<8x8xbf16>
    %cst_25 = arith.constant dense<0.000000e+00> : vector<8x8xf32>
    %70 = tpu.matmul %68, %69, %cst_25 {dimension_numbers = #tpu.dot_dimension_numbers<[1], [1], [0], [0], [0, 0, 1, 0], [], []>} : vector<8x8xbf16>, vector<8x8xbf16>, vector<8x8xf32> -> vector<8x8xf32>
    %cst_26 = arith.constant dense<0xFF800000> : vector<8xf32>
    %71 = vector.multi_reduction <maximumf>, %70, %cst_26 [1] : vector<8x8xf32> to vector<8xf32>
    %72 = vector.shape_cast %71 : vector<8xf32> to vector<8x1xf32>
    %73 = vector.broadcast %72 : vector<8x1xf32> to vector<8x8xf32>
    %74 = arith.subf %70, %73 : vector<8x8xf32>
    %75 = math.exp %74 : vector<8x8xf32>
    %cst_27 = arith.constant dense<0.000000e+00> : vector<8xf32>
    %76 = vector.multi_reduction <add>, %75, %cst_27 [1] : vector<8x8xf32> to vector<8xf32>
    %77 = vector.shape_cast %76 : vector<8xf32> to vector<8x1xf32>
    %78 = tpu.reciprocal %77 {approx = true} : vector<8x1xf32> -> vector<8x1xf32>
    %79 = vector.broadcast %78 : vector<8x1xf32> to vector<8x8xf32>
    %80 = arith.mulf %75, %79 : vector<8x8xf32>
    %81 = arith.truncf %80 : vector<8x8xf32> to vector<8x8xbf16>
    %82 = vector.extract_strided_slice %50 {offsets = [0, 8], sizes = [8, 8], strides = [1, 1]} : vector<8x32xbf16> to vector<8x8xbf16>
    %cst_28 = arith.constant dense<0.000000e+00> : vector<8x8xf32>
    %83 = tpu.matmul %81, %82, %cst_28 {dimension_numbers = #tpu.dot_dimension_numbers<[1], [0], [0], [1], [0, 0, 1, 1], [], []>} : vector<8x8xbf16>, vector<8x8xbf16>, vector<8x8xf32> -> vector<8x8xf32>
    %c0_29 = arith.constant 0 : index
    %c8 = arith.constant 8 : index
    %84 = vector.load %arg9[%c0_29, %c8] : memref<8x32xf32, #tpu.memory_space<vmem>>, vector<8x8xf32>
    tpu.vector_store %arg9[%c0_29, %c8], %83 {strides = array<i32>} : memref<8x32xf32, #tpu.memory_space<vmem>>, vector<8x8xf32>,
    %85 = vector.extract_strided_slice %46 {offsets = [0, 16], sizes = [8, 8], strides = [1, 1]} : vector<8x32xbf16> to vector<8x8xbf16>
    %86 = vector.extract_strided_slice %48 {offsets = [0, 16], sizes = [8, 8], strides = [1, 1]} : vector<8x32xbf16> to vector<8x8xbf16>
    %cst_30 = arith.constant dense<0.000000e+00> : vector<8x8xf32>
    %87 = tpu.matmul %85, %86, %cst_30 {dimension_numbers = #tpu.dot_dimension_numbers<[1], [1], [0], [0], [0, 0, 1, 0], [], []>} : vector<8x8xbf16>, vector<8x8xbf16>, vector<8x8xf32> -> vector<8x8xf32>
    %cst_31 = arith.constant dense<0xFF800000> : vector<8xf32>
    %88 = vector.multi_reduction <maximumf>, %87, %cst_31 [1] : vector<8x8xf32> to vector<8xf32>
    %89 = vector.shape_cast %88 : vector<8xf32> to vector<8x1xf32>
    %90 = vector.broadcast %89 : vector<8x1xf32> to vector<8x8xf32>
    %91 = arith.subf %87, %90 : vector<8x8xf32>
    %92 = math.exp %91 : vector<8x8xf32>
    %cst_32 = arith.constant dense<0.000000e+00> : vector<8xf32>
    %93 = vector.multi_reduction <add>, %92, %cst_32 [1] : vector<8x8xf32> to vector<8xf32>
    %94 = vector.shape_cast %93 : vector<8xf32> to vector<8x1xf32>
    %95 = tpu.reciprocal %94 {approx = true} : vector<8x1xf32> -> vector<8x1xf32>
    %96 = vector.broadcast %95 : vector<8x1xf32> to vector<8x8xf32>
    %97 = arith.mulf %92, %96 : vector<8x8xf32>
    %98 = arith.truncf %97 : vector<8x8xf32> to vector<8x8xbf16>
    %99 = vector.extract_strided_slice %50 {offsets = [0, 16], sizes = [8, 8], strides = [1, 1]} : vector<8x32xbf16> to vector<8x8xbf16>
    %cst_33 = arith.constant dense<0.000000e+00> : vector<8x8xf32>
    %100 = tpu.matmul %98, %99, %cst_33 {dimension_numbers = #tpu.dot_dimension_numbers<[1], [0], [0], [1], [0, 0, 1, 1], [], []>} : vector<8x8xbf16>, vector<8x8xbf16>, vector<8x8xf32> -> vector<8x8xf32>
    %c0_34 = arith.constant 0 : index
    %c16 = arith.constant 16 : index
    %101 = vector.load %arg9[%c0_34, %c16] : memref<8x32xf32, #tpu.memory_space<vmem>>, vector<8x8xf32>
    tpu.vector_store %arg9[%c0_34, %c16], %100 {strides = array<i32>} : memref<8x32xf32, #tpu.memory_space<vmem>>, vector<8x8xf32>,
    %102 = vector.extract_strided_slice %46 {offsets = [0, 24], sizes = [8, 8], strides = [1, 1]} : vector<8x32xbf16> to vector<8x8xbf16>
    %103 = vector.extract_strided_slice %48 {offsets = [0, 24], sizes = [8, 8], strides = [1, 1]} : vector<8x32xbf16> to vector<8x8xbf16>
    %cst_35 = arith.constant dense<0.000000e+00> : vector<8x8xf32>
    %104 = tpu.matmul %102, %103, %cst_35 {dimension_numbers = #tpu.dot_dimension_numbers<[1], [1], [0], [0], [0, 0, 1, 0], [], []>} : vector<8x8xbf16>, vector<8x8xbf16>, vector<8x8xf32> -> vector<8x8xf32>
    %cst_36 = arith.constant dense<0xFF800000> : vector<8xf32>
    %105 = vector.multi_reduction <maximumf>, %104, %cst_36 [1] : vector<8x8xf32> to vector<8xf32>
    %106 = vector.shape_cast %105 : vector<8xf32> to vector<8x1xf32>
    %107 = vector.broadcast %106 : vector<8x1xf32> to vector<8x8xf32>
    %108 = arith.subf %104, %107 : vector<8x8xf32>
    %109 = math.exp %108 : vector<8x8xf32>
    %cst_37 = arith.constant dense<0.000000e+00> : vector<8xf32>
    %110 = vector.multi_reduction <add>, %109, %cst_37 [1] : vector<8x8xf32> to vector<8xf32>
    %111 = vector.shape_cast %110 : vector<8xf32> to vector<8x1xf32>
    %112 = tpu.reciprocal %111 {approx = true} : vector<8x1xf32> -> vector<8x1xf32>
    %113 = vector.broadcast %112 : vector<8x1xf32> to vector<8x8xf32>
    %114 = arith.mulf %109, %113 : vector<8x8xf32>
    %115 = arith.truncf %114 : vector<8x8xf32> to vector<8x8xbf16>
    %116 = vector.extract_strided_slice %50 {offsets = [0, 24], sizes = [8, 8], strides = [1, 1]} : vector<8x32xbf16> to vector<8x8xbf16>
    %cst_38 = arith.constant dense<0.000000e+00> : vector<8x8xf32>
    %117 = tpu.matmul %115, %116, %cst_38 {dimension_numbers = #tpu.dot_dimension_numbers<[1], [0], [0], [1], [0, 0, 1, 1], [], []>} : vector<8x8xbf16>, vector<8x8xbf16>, vector<8x8xf32> -> vector<8x8xf32>
    %c0_39 = arith.constant 0 : index
    %c24 = arith.constant 24 : index
    %118 = vector.load %arg9[%c0_39, %c24] : memref<8x32xf32, #tpu.memory_space<vmem>>, vector<8x8xf32>
    tpu.vector_store %arg9[%c0_39, %c24], %117 {strides = array<i32>} : memref<8x32xf32, #tpu.memory_space<vmem>>, vector<8x8xf32>,
    %c0_40 = arith.constant 0 : index
    %c0_41 = arith.constant 0 : index
    %119 = vector.load %arg9[%c0_40, %c0_41] : memref<8x32xf32, #tpu.memory_space<vmem>>, vector<8x32xf32>
    %120 = arith.truncf %119 : vector<8x32xf32> to vector<8x32xbf16>
    %c0_42 = arith.constant 0 : index
    %c0_43 = arith.constant 0 : index
    %121 = vector.load %arg5[%c0_42, %c0_43] : memref<32x32xbf16, #tpu.memory_space<vmem>>, vector<32x32xbf16>
    %cst_44 = arith.constant dense<0.000000e+00> : vector<8x32xf32>
    %122 = tpu.matmul %120, %121, %cst_44 {dimension_numbers = #tpu.dot_dimension_numbers<[1], [0], [0], [1], [0, 0, 1, 1], [], []>} : vector<8x32xbf16>, vector<32x32xbf16>, vector<8x32xf32> -> vector<8x32xf32>
    %123 = vector.shape_cast %5 : vector<32xf32> to vector<1x32xf32>
    %124 = vector.broadcast %123 : vector<1x32xf32> to vector<8x32xf32>
    %125 = arith.addf %122, %124 : vector<8x32xf32>
    %126 = vector.shape_cast %7 : vector<32xf32> to vector<1x32xf32>
    %127 = vector.broadcast %126 : vector<1x32xf32> to vector<8x32xf32>
    %128 = arith.mulf %127, %125 : vector<8x32xf32>
    %129 = arith.addf %17, %128 : vector<8x32xf32>
    %cst_45 = arith.constant dense<0.000000e+00> : vector<8xf32>
    %130 = vector.multi_reduction <add>, %129, %cst_45 [1] : vector<8x32xf32> to vector<8xf32>
    %131 = vector.shape_cast %130 : vector<8xf32> to vector<8x1xf32>
    %cst_46 = arith.constant 3.200000e+01 : f32
    %132 = vector.broadcast %cst_46 : f32 to vector<8x1xf32>
    %133 = arith.divf %131, %132 : vector<8x1xf32>
    %134 = vector.broadcast %133 : vector<8x1xf32> to vector<8x32xf32>
    %135 = arith.subf %129, %134 : vector<8x32xf32>
    %136 = arith.mulf %135, %135 : vector<8x32xf32>
    %cst_47 = arith.constant dense<0.000000e+00> : vector<8xf32>
    %137 = vector.multi_reduction <add>, %136, %cst_47 [1] : vector<8x32xf32> to vector<8xf32>
    %138 = vector.shape_cast %137 : vector<8xf32> to vector<8x1xf32>
    %cst_48 = arith.constant 3.200000e+01 : f32
    %139 = vector.broadcast %cst_48 : f32 to vector<8x1xf32>
    %140 = arith.divf %138, %139 : vector<8x1xf32>
    %cst_49 = arith.constant 9.99999974E-6 : f32
    %141 = vector.broadcast %cst_49 : f32 to vector<8x1xf32>
    %142 = arith.addf %140, %141 : vector<8x1xf32>
    %143 = math.rsqrt %142 : vector<8x1xf32>
    %144 = vector.broadcast %143 : vector<8x1xf32> to vector<8x32xf32>
    %145 = arith.mulf %135, %144 : vector<8x32xf32>
    %146 = vector.shape_cast %9 : vector<32xf32> to vector<1x32xf32>
    %147 = vector.broadcast %146 : vector<1x32xf32> to vector<8x32xf32>
    %148 = arith.mulf %145, %147 : vector<8x32xf32>
    %149 = vector.shape_cast %11 : vector<32xf32> to vector<1x32xf32>
    %150 = vector.broadcast %149 : vector<1x32xf32> to vector<8x32xf32>
    %151 = arith.addf %148, %150 : vector<8x32xf32>
    %152 = arith.truncf %151 : vector<8x32xf32> to vector<8x32xbf16>
    %c0_50 = arith.constant 0 : index
    %c0_51 = arith.constant 0 : index
    %153 = vector.load %arg6[%c0_50, %c0_51] : memref<32x128xbf16, #tpu.memory_space<vmem>>, vector<32x128xbf16>
    %cst_52 = arith.constant dense<0.000000e+00> : vector<8x128xf32>
    %154 = tpu.matmul %152, %153, %cst_52 {dimension_numbers = #tpu.dot_dimension_numbers<[1], [0], [0], [1], [0, 0, 1, 1], [], []>} : vector<8x32xbf16>, vector<32x128xbf16>, vector<8x128xf32> -> vector<8x128xf32>
    %c0_53 = arith.constant 0 : index
    %c0_54 = arith.constant 0 : index
    %155 = vector.load %arg3[%c0_53, %c0_54] : memref<1x128xf32, #tpu.memory_space<vmem>>, vector<1x128xf32>
    %156 = vector.shape_cast %155 : vector<1x128xf32> to vector<128xf32>
    %157 = vector.shape_cast %156 : vector<128xf32> to vector<1x128xf32>
    %158 = vector.broadcast %157 : vector<1x128xf32> to vector<8x128xf32>
    %159 = arith.addf %154, %158 : vector<8x128xf32>
    %cst_55 = arith.constant 5.000000e-01 : f32
    %160 = vector.broadcast %cst_55 : f32 to vector<8x128xf32>
    %161 = arith.mulf %160, %159 : vector<8x128xf32>
    %cst_56 = arith.constant 0.707106769 : f32
    %162 = vector.broadcast %cst_56 : f32 to vector<8x128xf32>
    %163 = arith.mulf %159, %162 : vector<8x128xf32>
    %164 = math.absf %163 : vector<8x128xf32>
    %cst_57 = arith.constant 0.327591091 : f32
    %165 = vector.broadcast %cst_57 : f32 to vector<8x128xf32>
    %166 = arith.mulf %165, %164 : vector<8x128xf32>
    %cst_58 = arith.constant 1.000000e+00 : f32
    %167 = vector.broadcast %cst_58 : f32 to vector<8x128xf32>
    %168 = arith.addf %167, %166 : vector<8x128xf32>
    %cst_59 = arith.constant 1.000000e+00 : f32
    %169 = vector.broadcast %cst_59 : f32 to vector<8x128xf32>
    %170 = arith.divf %169, %168 : vector<8x128xf32>
    %cst_60 = arith.constant 1.06140542 : f32
    %171 = vector.broadcast %cst_60 : f32 to vector<8x128xf32>
    %172 = arith.mulf %171, %170 : vector<8x128xf32>
    %cst_61 = arith.constant -1.45315206 : f32
    %173 = vector.broadcast %cst_61 : f32 to vector<8x128xf32>
    %174 = arith.addf %172, %173 : vector<8x128xf32>
    %175 = arith.mulf %174, %170 : vector<8x128xf32>
    %cst_62 = arith.constant 1.42141378 : f32
    %176 = vector.broadcast %cst_62 : f32 to vector<8x128xf32>
    %177 = arith.addf %175, %176 : vector<8x128xf32>
    %178 = arith.mulf %177, %170 : vector<8x128xf32>
    %cst_63 = arith.constant -0.284496725 : f32
    %179 = vector.broadcast %cst_63 : f32 to vector<8x128xf32>
    %180 = arith.addf %178, %179 : vector<8x128xf32>
    %181 = arith.mulf %180, %170 : vector<8x128xf32>
    %cst_64 = arith.constant 0.254829586 : f32
    %182 = vector.broadcast %cst_64 : f32 to vector<8x128xf32>
    %183 = arith.addf %181, %182 : vector<8x128xf32>
    %184 = arith.mulf %183, %170 : vector<8x128xf32>
    %cst_65 = arith.constant 0.000000e+00 : f32
    %185 = vector.broadcast %cst_65 : f32 to vector<8x128xf32>
    %186 = arith.subf %185, %164 : vector<8x128xf32>
    %187 = arith.mulf %186, %164 : vector<8x128xf32>
    %188 = math.exp %187 : vector<8x128xf32>
    %189 = arith.mulf %184, %188 : vector<8x128xf32>
    %cst_66 = arith.constant 1.000000e+00 : f32
    %190 = vector.broadcast %cst_66 : f32 to vector<8x128xf32>
    %191 = arith.subf %190, %189 : vector<8x128xf32>
    %cst_67 = arith.constant 0.000000e+00 : f32
    %192 = vector.broadcast %cst_67 : f32 to vector<8x128xf32>
    %193 = arith.cmpf oge, %163, %192 : vector<8x128xf32>
    %cst_68 = arith.constant 0.000000e+00 : f32
    %194 = vector.broadcast %cst_68 : f32 to vector<8x128xf32>
    %195 = arith.subf %194, %191 : vector<8x128xf32>
    %196 = arith.select %193, %191, %195 : vector<8x128xi1>, vector<8x128xf32>
    %cst_69 = arith.constant 1.000000e+00 : f32
    %197 = vector.broadcast %cst_69 : f32 to vector<8x128xf32>
    %198 = arith.addf %197, %196 : vector<8x128xf32>
    %199 = arith.mulf %161, %198 : vector<8x128xf32>
    %200 = arith.truncf %199 : vector<8x128xf32> to vector<8x128xbf16>
    %c0_70 = arith.constant 0 : index
    %c0_71 = arith.constant 0 : index
    %201 = vector.load %arg7[%c0_70, %c0_71] : memref<128x32xbf16, #tpu.memory_space<vmem>>, vector<128x32xbf16>
    %cst_72 = arith.constant dense<0.000000e+00> : vector<8x32xf32>
    %202 = tpu.matmul %200, %201, %cst_72 {dimension_numbers = #tpu.dot_dimension_numbers<[1], [0], [0], [1], [0, 0, 1, 1], [], []>} : vector<8x128xbf16>, vector<128x32xbf16>, vector<8x32xf32> -> vector<8x32xf32>
    %203 = vector.shape_cast %13 : vector<32xf32> to vector<1x32xf32>
    %204 = vector.broadcast %203 : vector<1x32xf32> to vector<8x32xf32>
    %205 = arith.addf %202, %204 : vector<8x32xf32>
    %206 = vector.shape_cast %15 : vector<32xf32> to vector<1x32xf32>
    %207 = vector.broadcast %206 : vector<1x32xf32> to vector<8x32xf32>
    %208 = arith.mulf %207, %205 : vector<8x32xf32>
    %209 = arith.addf %129, %208 : vector<8x32xf32>
    %c0_73 = arith.constant 0 : index
    %c0_74 = arith.constant 0 : index
    %c0_75 = arith.constant 0 : index
    %210 = vector.load %arg8[%c0_73, %c0_74, %c0_75] : memref<1x8x32xf32, #tpu.memory_space<vmem>>, vector<1x8x32xf32>
    %211 = vector.shape_cast %210 : vector<1x8x32xf32> to vector<8x32xf32>
    %212 = vector.shape_cast %209 : vector<8x32xf32> to vector<1x8x32xf32>
    tpu.vector_store %arg8[%c0_73, %c0_74, %c0_75], %212 {strides = array<i32>} : memref<1x8x32xf32, #tpu.memory_space<vmem>>, vector<1x8x32xf32>,
    return
  }
  func.func @transform_0(%arg0: i32) -> (i32, i32, i32) {
    %c0_i32 = arith.constant 0 : i32
    %c0_i32_0 = arith.constant 0 : i32
    %c0_i32_1 = arith.constant 0 : i32
    return %arg0, %c0_i32, %c0_i32_0 : i32, i32, i32
  }
  func.func @transform_1(%arg0: i32) -> (i32, i32) {
    %c0_i32 = arith.constant 0 : i32
    %c0_i32_0 = arith.constant 0 : i32
    %c0_i32_1 = arith.constant 0 : i32
    return %c0_i32, %c0_i32_0 : i32, i32
  }
  func.func @transform_2(%arg0: i32) -> (i32, i32) {
    %c0_i32 = arith.constant 0 : i32
    %c0_i32_0 = arith.constant 0 : i32
    %c0_i32_1 = arith.constant 0 : i32
    return %c0_i32, %c0_i32_0 : i32, i32
  }
  func.func @transform_3(%arg0: i32) -> (i32, i32) {
    %c0_i32 = arith.constant 0 : i32
    %c0_i32_0 = arith.constant 0 : i32
    %c0_i32_1 = arith.constant 0 : i32
    return %c0_i32, %c0_i32_0 : i32, i32
  }
  func.func @transform_4(%arg0: i32) -> (i32, i32) {
    %c0_i32 = arith.constant 0 : i32
    %c0_i32_0 = arith.constant 0 : i32
    %c0_i32_1 = arith.constant 0 : i32
    return %c0_i32, %c0_i32_0 : i32, i32
  }
  func.func @transform_5(%arg0: i32) -> (i32, i32) {
    %c0_i32 = arith.constant 0 : i32
    %c0_i32_0 = arith.constant 0 : i32
    %c0_i32_1 = arith.constant 0 : i32
    return %c0_i32, %c0_i32_0 : i32, i32
  }
  func.func @transform_6(%arg0: i32) -> (i32, i32) {
    %c0_i32 = arith.constant 0 : i32
    %c0_i32_0 = arith.constant 0 : i32
    %c0_i32_1 = arith.constant 0 : i32
    return %c0_i32, %c0_i32_0 : i32, i32
  }
  func.func @transform_7(%arg0: i32) -> (i32, i32, i32) {
    %c0_i32 = arith.constant 0 : i32
    %c0_i32_0 = arith.constant 0 : i32
    %c0_i32_1 = arith.constant 0 : i32
    return %arg0, %c0_i32, %c0_i32_0 : i32, i32, i32
  }
}

</mosaic_0001>

<bundles_post_ra>
// kernel: _layer_scale_block_impl.1
= control target key start
LH: loop header
LB: loop body
LE: loop exit
PB: predicated region body
PF: predicated region fallthrough
CT: control target
= control target key end

     0   :  { %12 = vsyncpa [#allocation4], 0  ;;  %s1853_s0 = inlined_call_operand.vmem [shape: f32[2,8,32], index: 0, kind: input, shape index: {}]   ;;  %s1854_s1 = inlined_call_operand.vmem [shape: f32[8,32], index: 1, kind: input, shape index: {}]   ;;  %s1855_s2 = inlined_call_operand.vmem [shape: f32[1,128], index: 2, kind: input, shape index: {}]   ;;  %s1856_s3 = inlined_call_operand.vmem [shape: bf16[32,96], index: 3, kind: input, shape index: {}]   ;;  %s1857_s4 = inlined_call_operand.vmem [shape: bf16[32,32], index: 4, kind: input, shape index: {}]   ;;  %s1858_s5 = inlined_call_operand.vmem [shape: bf16[32,128], index: 5, kind: input, shape index: {}]   ;;  %s1859_s6 = inlined_call_operand.vmem [shape: bf16[128,32], index: 6, kind: input, shape index: {}]   ;;  %s1860_s7 = inlined_call_operand.hbm [shape: f32[2,8,32], index: 7, kind: output, shape index: {}]  }
   0x1   :  { %14 = vsyncpa [#allocation4 + $0x1], 0  ;;  %s1592_s24 = smov 0   ;;  %s1594_s25 = smov 0  }
   0x2   :  { %s1596_s26 = smov 0   ;;  %s1598_s27 = smov 0  }
   0x3 LB: > { %s1613_s28 = sadd.s32 4294967295, %s1533_s27   ;;  %s1210_s29 = sadd.s32 4294967294, %s1533_s27   ;;  %s1533_s27 = sphi %s1598_s27, %s1866_s27   ;;  %s1529_s26 = sphi %s1596_s26, %s1865_s26   ;;  %s1525_s25 = sphi %s1594_s25, %s1864_s25   ;;  %s1521_s24 = sphi %s1592_s24, %s1863_s24  }
   0x4   : > { %s1617_s30 = sadd.s32 1, %s1533_s27   ;;  %s179_s8 = sadd.s32 1, %s1529_s26 }
   0x5   : > { %s176_s9 = ssub.s32 %s1533_s27, %s1617_s30  ;;  %p189_p0 = scmp.ne.s32.totalorder %s1529_s26, %s1525_s25 }
   0x6   : > { %p177_p1 = scmp.eq.s32.totalorder %s176_s9, 0  ;;  %p190_p2 = scmp.eq.s32.totalorder %s1613_s28, 1 }
   0x7   : > { %p195_p3 = scmp.ne.s32.totalorder %s1525_s25, %s1521_s24  ;;  %p196_p4 = scmp.eq.s32.totalorder %s1210_s29, 1 }
   0x8   : > { %s1628_s10 = scalar_select %p177_p1, %s1529_s26, %s179_s8  }
   0x9   : > { %p1630_p5 = por %p190_p2, %p189_p0  ;;  %p1634_p6 = por %p196_p4, %p195_p3 }
   0xa   : > { %p1213_p7 = scmp.ge.s32.totalorder %s1533_s27, 1  ;;  %p239_p8 = scmp.lt.s32.totalorder %s1533_s27, 3 }
   0xc   : > { %p240_p9 = pnand %p1213_p7, %p239_p8 }
   0xd   : > { %p270_p10 = scmp.lt.s32.totalorder (!%p240_p9), %s1613_s28, 1  ;;  %s1537_s9 = smov (!%p240_p9), 96  }
   0xe   : > { %243 = sbr.rel (%p240_p9) target bundleno = 2507 (0x9cb), region = 48  ;;  %s1540_s15 = smov (!%p240_p9), 80  }
   0xf   : > { %s1541_s16 = smov (!%p240_p9), 112   ;;  %s1543_s18 = smov (!%p240_p9), 104  }
  0x10   : > { %s1544_s19 = smov (!%p240_p9), 64   ;;  %s1545_s20 = smov (!%p240_p9), 56  }
  0x11   : > { %s1546_s21 = smov (!%p240_p9), 48   ;;  %s1547_s22 = smov (!%p240_p9), 40  }
  0x12   : > { %s1548_s23 = smov (!%p240_p9), 8   ;;  %s1251_s29 = sshll.u32 (!%p240_p9), %s1613_s28, 7 }
  0x13   : > { %s271_s13 = scalar_select %p270_p10, %s1613_s28, 1  ;;  %vm284_vm0 = vcmask 261120   ;;  %v1435_v7 = vld [vmem:[%s1856_s3 + $0x8] sm:$0xff]   ;;  %v1535_v8 = vmov 0.0   ;;  %vm1536_vm1 = vmmov 0   ;;  %v1436_v9 = vld [vmem:[%s1856_s3] sm:$0xff]  }
  0x14   : > { %1288 = vmatprep.subr.bf16.mxu0 %v1535_v8  ;;  %1292 = vmatprep.mubr.msk.bf16.mxu0 %vm1536_vm1, %v1535_v8  ;;  %v1216_v14 = vld [vmem:[%s1854_s1] ss:$0 sm:$0xff]  ;;  %v1217_v16 = vld [vmem:[%s1854_s1 + $0x1] ss:$0 sm:$0xff]  ;;  %vm375_vm2 = vcmask 64512   ;;  %vm439_vm3 = vcmask 1043456  }
  0x15   : > { %s1215_s14 = sshll.u32 %s271_s13, 3  ;;  %1289 = vmatpush3.bf16.msra.mxu0 %v1435_v7  ;;  %1308 = vmatprep.subr.bf16.mxu1 %v1535_v8  ;;  %s1538_s13 = smov 120   ;;  %vm599_vm4 = vcmask 130112   ;;  %vm715_vm5 = vcmask 195712   ;;  %vm831_vm6 = vcmask 261312  }
  0x16   : > { %s273_s17 = scalar_lea.vmem %s1853_s0, %s1215_s14  ;;  %1290 = vmatprep.subr.bf16.mxu0 %v1535_v8  ;;  %1310 = vmatprep.mubr.msk.bf16.mxu1 %vm1536_vm1, %v1535_v8  ;;  %s1539_s14 = smov 88  }
  0x17   : > { %v1645_v0 = vld [vmem:[%s273_s17] sm:$0xff]  ;;  %s1542_s17 = smov 72   ;;  %s1551_s28 = smov [#allocation3]  }
  0x18   : > { %v285_v1 = vsel %vm284_vm0, %v1645_v0, 0.0 }
  0x19   : > { %286 = vadd.xlane.f32.xlu0 %v285_v1  ;;  %1291 = vmatpush3.bf16.msra.mxu0 %v1436_v9 }
  0x1a   : > { %1296 = vmatprep.subr.bf16.mxu0 %v1535_v8 }
  0xa2   : > { %v287_v2 = vpop.xlane.xlu0 %286 }
  0xa3   : > { %v289_v3 = vmul.f32 0.03125, %v287_v2 }
  0xa5   : > { %v290_v4 = vsub.f32 %v1645_v0, %v289_v3 }
  0xa7   : > { %v291_v5 = vmul.f32 %v290_v4, %v290_v4 }
  0xa9   : > { %v292_v6 = vsel %vm284_vm0, %v291_v5, 0.0 }
  0xaa   : > { %293 = vadd.xlane.f32.xlu0 %v292_v6 }
 0x133   : > { %v294_v10 = vpop.xlane.xlu0 %293 }
 0x134   : > { %v295_v11 = vmul.f32 0.03125, %v294_v10 }
 0x136   : > { %v296_v12 = vadd.f32 1e-05, %v295_v11 }
 0x138   : > { %1449 = vrsqrt.f32 %v296_v12 }
 0x145   : > { %v1450_v13 = vpop.eup %1449 }
 0x146   : > { %v298_v15 = vmul.f32 %v1450_v13, %v290_v4 }
 0x148   : > { %v303_v17 = vmul.f32 %v1216_v14, %v298_v15 }
 0x14a   : > { %v308_v18 = vadd.f32 %v1217_v16, %v303_v17 }
 0x14c   : > { %v309_v19 = vpack.c.bf16 %v308_v18, %v308_v18 }
 0x14e   : > { %1293 = vmatmul.mubr.msk.bf16.vlgmr.msra.gmra.mxu0 %vm284_vm0, %v309_v19 }
 0x14f   : > { %1298 = vmatprep.mubr.msk.bf16.mxu0 %vm1536_vm1, %v1535_v8 }
 0x20e   : > { %v363_v20 = vpop.f32.mrf.mxu0 }
 0x20f   : > { %v369_v21 = vmul.f32 0.35355338, %v363_v20  ;;  %v1674_v22 = vpack.c.bf16 %v363_v20, %v363_v20 }
 0x210   : > { %v1294_v23 = vpop.f32.mrf.mxu0 }
 0x211   : > { %v370_v24 = vpack.c.bf16 %v369_v21, %v369_v21  ;;  %373 = vrot.lane.b32.xlu1 %v1674_v22, %s1537_s9 }
 0x212   : > { %v366_v25 = vpop.f32.mrf.mxu0 }
 0x213   : > { %485 = vrot.lane.b32.xlu0 %v370_v24, %s1538_s13 }
 0x214   : > { %v1295_v26 = vpop.f32.mrf.mxu0 }
 0x215   : > { %487 = vrot.lane.b32.xlu1 %v1674_v22, %s1539_s14  ;;  %s1549_s14 = smov 16  }
 0x219   : > { %603 = vrot.lane.b32.xlu1 %v1674_v22, %s1540_s15  ;;  %s1550_s15 = smov 24  }
 0x21d   : > { %601 = vrot.lane.b32.xlu1 %v370_v24, %s1541_s16 }
 0x221   : > { %719 = vrot.lane.b32.xlu1 %v1674_v22, %s1542_s17 }
 0x225   : > { %717 = vrot.lane.b32.xlu1 %v370_v24, %s1543_s18  ;;  %s267_s18 = sand.u32 1, %s1525_s25  }
 0x226   : > { %s1138_s16 = scalar_lea.sflag [#allocation4], %s267_s18 }
 0x283   : > { %v374_v27 = vpop.permute.xlu1 %373 }
 0x284   : > { %v380_v28 = vsel %vm375_vm2, %v374_v27, 0 }
 0x285   : > { %1297 = vmatpush3.bf16.xpose.msra.mxu0 %v380_v28  ;;  %v486_v32 = vpop.permute.xlu0 %485 }
 0x286   : > { %1302 = vmatprep.subr.bf16.mxu0 %v1535_v8 }
 0x287   : > { %v488_v29 = vpop.permute.xlu1 %487 }
 0x288   : > { %v493_v30 = vsel %vm375_vm2, %v488_v29, 0 }
 0x289   : > { %1309 = vmatpush3.bf16.xpose.msra.mxu1 %v493_v30 }
 0x28a   : > { %1320 = vmatprep.subr.bf16.mxu1 %v1535_v8 }
 0x28b   : > { %v604_v31 = vpop.permute.xlu1 %603 }
 0x28c   : > { %1299 = vmatmul.mubr.msk.bf16.vlgmr.msra.gmra.mxu0 %vm375_vm2, %v370_v24  ;;  %v609_v34 = vsel %vm375_vm2, %v604_v31, 0 }
 0x28d   : > { %1304 = vmatprep.mubr.msk.bf16.mxu0 %vm1536_vm1, %v1535_v8 }
 0x28f   : > { %v602_v33 = vpop.permute.xlu1 %601 }
 0x290   : > { %1311 = vmatmul.mubr.msk.bf16.vlgmr.msra.gmra.mxu1 %vm375_vm2, %v486_v32 }
 0x291   : > { %1321 = vmatpush3.bf16.xpose.msra.mxu1 %v609_v34  ;;  %1322 = vmatprep.mubr.msk.bf16.mxu1 %vm1536_vm1, %v1535_v8 }
 0x292   : > { %1332 = vmatprep.subr.bf16.mxu1 %v1535_v8 }
 0x293   : > { %v720_v35 = vpop.permute.xlu1 %719 }
 0x294   : > { %v725_v36 = vsel %vm375_vm2, %v720_v35, 0 }
 0x297   : > { %v718_v37 = vpop.permute.xlu1 %717 }
 0x298   : > { %1323 = vmatmul.mubr.msk.bf16.vlgmr.msra.gmra.mxu1 %vm375_vm2, %v602_v33 }
 0x299   : > { %1333 = vmatpush3.bf16.xpose.msra.mxu1 %v725_v36  ;;  %1334 = vmatprep.mubr.msk.bf16.mxu1 %vm1536_vm1, %v1535_v8 }
 0x29a   : > { %1344 = vmatprep.subr.bf16.mxu1 %v1535_v8 }
 0x2a0   : > { %1335 = vmatmul.mubr.msk.bf16.vlgmr.msra.gmra.mxu1 %vm375_vm2, %v718_v37 }
 0x2a1   : > { %1348 = vmatprep.mubr.msk.bf16.mxu1 %vm1536_vm1, %v1535_v8 }
 0x34c   : > { %v416_v38 = vpop.f32.mrf.mxu0 }
 0x34d   : > { %v422_v39 = vsel %vm375_vm2, %v416_v38, -inf }
 0x34e   : > { %423 = vmax.xlane.f32.xlu1 %v422_v39  ;;  %v1300_v40 = vpop.f32.mrf.mxu0 }
 0x350   : > { %v419_v41 = vpop.f32.mrf.mxu0  ;;  %v529_v42 = vpop.f32.mrf.mxu1 }
 0x351   : > { %v535_v43 = vsel %vm375_vm2, %v529_v42, -inf }
 0x352   : > { %536 = vmax.xlane.f32.xlu0 %v535_v43  ;;  %v1301_v44 = vpop.f32.mrf.mxu0  ;;  %v1312_v45 = vpop.f32.mrf.mxu1 }
 0x354   : > { %v532_v46 = vpop.f32.mrf.mxu1 }
 0x356   : > { %v1313_v47 = vpop.f32.mrf.mxu1 }
 0x358   : > { %v645_v48 = vpop.f32.mrf.mxu1 }
 0x359   : > { %v651_v49 = vsel %vm375_vm2, %v645_v48, -inf }
 0x35a   : > { %v1324_v50 = vpop.f32.mrf.mxu1  ;;  %652 = vmax.xlane.f32.xlu1 %v651_v49  ;;  %v1438_v49 = vld [vmem:[%s1857_s4] sm:$0xff]  }
 0x35c   : > { %v648_v51 = vpop.f32.mrf.mxu1 }
 0x35e   : > { %v1325_v52 = vpop.f32.mrf.mxu1 }
 0x360   : > { %v761_v53 = vpop.f32.mrf.mxu1 }
 0x361   : > { %v767_v54 = vsel %vm375_vm2, %v761_v53, -inf }
 0x362   : > { %768 = vmax.xlane.f32.xlu0 %v767_v54  ;;  %v1336_v55 = vpop.f32.mrf.mxu1 }
 0x364   : > { %v764_v56 = vpop.f32.mrf.mxu1 }
 0x366   : > { %v1337_v57 = vpop.f32.mrf.mxu1 }
 0x3d7   : > { %v424_v58 = vpop.xlane.xlu1 %423 }
 0x3d8   : > { %v425_v59 = vsub.f32 %v416_v38, %v424_v58 }
 0x3da   : > { %v426_v60 = vmul.f32 1.442695, %v425_v59 }
 0x3db   : > { %v537_v61 = vpop.xlane.xlu0 %536 }
 0x3dc   : > { %1451 = vpow2.f32 %v426_v60  ;;  %v538_v62 = vsub.f32 %v529_v42, %v537_v61 }
 0x3de   : > { %v539_v63 = vmul.f32 1.442695, %v538_v62 }
 0x3e0   : > { %1453 = vpow2.f32 %v539_v63  ;;  %v1229_v63 = vld [vmem:[%s1854_s1 + $0x2] ss:$0 sm:$0xff] }
 0x3e3   : > { %v653_v11 = vpop.xlane.xlu1 %652 }
 0x3e4   : > { %v654_v12 = vsub.f32 %v645_v48, %v653_v11  ;;  %v1437_v48 = vld [vmem:[%s1857_s4 + $0x8] sm:$0xff]  }
 0x3e5   : > { %1345 = vmatpush3.bf16.msra.mxu1 %v1437_v48 }
 0x3e6   : > { %v655_v13 = vmul.f32 1.442695, %v654_v12  ;;  %1346 = vmatprep.subr.bf16.mxu1 %v1535_v8 }
 0x3e9   : > { %v1452_v1 = vpop.eup %1451  ;;  %1347 = vmatpush3.bf16.msra.mxu1 %v1438_v49 }
 0x3ea   : > { %v428_v2 = vsel %vm375_vm2, %v1452_v1, 0.0  ;;  %1360 = vmatprep.subr.bf16.mxu1 %v1535_v8 }
 0x3eb   : > { %v769_v3 = vpop.xlane.xlu0 %768  ;;  %429 = vadd.xlane.f32.xlu1 %v428_v2 }
 0x3ec   : > { %v770_v4 = vsub.f32 %v761_v53, %v769_v3 }
 0x3ed   : > { %v1454_v5 = vpop.eup %1453 }
 0x3ee   : > { %v771_v6 = vmul.f32 1.442695, %v770_v4  ;;  %v541_v7 = vsel %vm375_vm2, %v1454_v5, 0.0 }
 0x3ef   : > { %542 = vadd.xlane.f32.xlu0 %v541_v7 }
 0x3f0   : > { %1455 = vpow2.f32 %v771_v6 }
 0x3f1   : > { %1457 = vpow2.f32 %v655_v13 }
 0x3fc   : > { %434 = vrot.lane.b32.xlu1 %v1674_v22, %s1544_s19  ;;  %s1214_s19 = sshll.u32 %s267_s18, 3 }
 0x3fd   : > { %v1456_v9 = vpop.eup %1455  ;;  %s269_s8 = scalar_lea.vmem [#allocation3], %s1214_s19  ;;  %s1477_s19 = sshll.u32 %s1551_s28, 4  ;;  %s1478_s19 = int_to_ptr.vmem [resolvable:$false] %s1477_s19 }
 0x3fe   : > { %v773_v10 = vsel %vm375_vm2, %v1456_v9, 0.0  ;;  %v1458_v14 = vpop.eup %1457  ;;  %s1151_s9 = sshll.u32 %s269_s8, 4  ;;  %s1152_s9 = int_to_ptr.vmem [resolvable:$true] %s1151_s9 }
 0x3ff   : > { %774 = vadd.xlane.f32.xlu0 %v773_v10  ;;  %v657_v15 = vsel %vm375_vm2, %v1458_v14, 0.0  ;;  %s1473_s17 = scalar_lea.vmem %s1152_s9, 128  ;;  %p1480_p0 = scmp.lt.s32.totalorder %s1152_s9, %s1478_s19 }
 0x400   : > { %p1474_p11 = scmp.ne.s32.totalorder %s1152_s9, %s1473_s17 }
 0x402   : > { %p1475_p12 = pnand %p1474_p11, %p1630_p5 }
 0x404   : > { %p1476_p13 = pneg %p1475_p12 }
 0x415   : > { %547 = vrot.lane.b32.xlu0 %v1674_v22, %s1545_s20  ;;  %s1479_s20 = scalar_lea.vmem %s1478_s19, 256 }
 0x416   : > { %p1481_p1 = scmp.lt.s32.totalorder %s1479_s20, %s1473_s17 }
 0x418   : > { %p1482_p2 = por %p1481_p1, %p1480_p0 }
 0x41a   : > { %p1483_p3 = pnand %p1482_p2, %p1476_p13 }
 0x420   : > { %658 = vadd.xlane.f32.xlu1 %v657_v15 }
 0x431   : > { %663 = vrot.lane.b32.xlu1 %v1674_v22, %s1546_s21 }
 0x435   : > { %779 = vrot.lane.b32.xlu1 %v1674_v22, %s1547_s22 }
 0x474   : > { %v430_v16 = vpop.xlane.xlu1 %429 }
 0x475   : > { %1459 = vrcp.f32 %v430_v16  ;;  %v1439_v16 = vld [vmem:[%s1858_s5 + $0x8] sm:$0xff]  }
 0x478   : > { %v543_v17 = vpop.xlane.xlu0 %542  ;;  %v435_v18 = vpop.permute.xlu1 %434 }
 0x479   : > { %v441_v19 = vsel %vm439_vm3, %v435_v18, 0  ;;  %1461 = vrcp.f32 %v543_v17 }
 0x47a   : > { %1303 = vmatpush3.bf16.msra.mxu0 %v441_v19 }
 0x47b   : > { %1314 = vmatprep.subr.bf16.mxu0 %v1535_v8 }
 0x482   : > { %v1460_v20 = vpop.eup %1459 }
 0x483   : > { %v432_v21 = vmul.f32 %v1460_v20, %v1452_v1  ;;  %v1233_v1 = vld [vmem:[%s1854_s1 + $0x3] ss:$0 sm:$0xff] }
 0x485   : > { %v433_v23 = vpack.c.bf16 %v432_v21, %v432_v21  ;;  %v1234_v21 = vld [vmem:[%s1854_s1 + $0x4] ss:$0 sm:$0xff] }
 0x486   : > { %v1462_v24 = vpop.eup %1461 }
 0x487   : > { %1305 = vmatmul.mubr.msk.bf16.vlgmr.msra.gmra.mxu0 %vm375_vm2, %v433_v23  ;;  %v545_v22 = vmul.f32 %v1462_v24, %v1454_v5  ;;  %v1235_v24 = vld [vmem:[%s1854_s1 + $0x5] ss:$0 sm:$0xff] }
 0x488   : > { %v775_v25 = vpop.xlane.xlu0 %774  ;;  %1316 = vmatprep.mubr.msk.bf16.mxu0 %vm1536_vm1, %v1535_v8 }
 0x489   : > { %v546_v28 = vpack.c.bf16 %v545_v22, %v545_v22 }
 0x48c   : > { %v548_v26 = vpop.permute.xlu0 %547 }
 0x48d   : > { %v553_v27 = vsel %vm439_vm3, %v548_v26, 0 }
 0x48e   : > { %1315 = vmatpush3.bf16.msra.mxu0 %v553_v27  ;;  %v1441_v27 = vld [vmem:[%s1859_s6 + $0x38] sm:$0xff]  }
 0x48f   : > { %1326 = vmatprep.subr.bf16.mxu0 %v1535_v8 }
 0x491   : > { %1317 = vmatmul.mubr.msk.bf16.vlgmr.msra.gmra.mxu0 %vm375_vm2, %v546_v28  ;;  %v1442_v28 = vld [vmem:[%s1859_s6 + $0x30] sm:$0xff]  }
 0x492   : > { %1328 = vmatprep.mubr.msk.bf16.mxu0 %vm1536_vm1, %v1535_v8 }
 0x4a9   : > { %v659_v29 = vpop.xlane.xlu1 %658 }
 0x4aa   : > { %1463 = vrcp.f32 %v659_v29  ;;  %v1443_v29 = vld [vmem:[%s1859_s6 + $0x28] sm:$0xff]  }
 0x4ab   : > { %1465 = vrcp.f32 %v775_v25 }
 0x4ad   : > { %v664_v30 = vpop.permute.xlu1 %663 }
 0x4ae   : > { %v669_v31 = vsel %vm439_vm3, %v664_v30, 0  ;;  %v1444_v30 = vld [vmem:[%s1859_s6 + $0x20] sm:$0xff]  }
 0x4af   : > { %1327 = vmatpush3.bf16.msra.mxu0 %v669_v31  ;;  %v1445_v31 = vld [vmem:[%s1859_s6 + $0x18] sm:$0xff]  }
 0x4b0   : > { %1338 = vmatprep.subr.bf16.mxu0 %v1535_v8 }
 0x4b1   : > { %v780_v34 = vpop.permute.xlu1 %779 }
 0x4b2   : > { %v785_v37 = vsel %vm439_vm3, %v780_v34, 0  ;;  %v1448_v34 = vld [vmem:[%s1859_s6] sm:$0xff]  }
 0x4b7   : > { %v1464_v32 = vpop.eup %1463 }
 0x4b8   : > { %v661_v33 = vmul.f32 %v1464_v32, %v1458_v14  ;;  %v1466_v36 = vpop.eup %1465  ;;  %v1446_v32 = vld [vmem:[%s1859_s6 + $0x10] sm:$0xff]  }
 0x4b9   : > { %v777_v38 = vmul.f32 %v1466_v36, %v1456_v9 }
 0x4ba   : > { %v662_v35 = vpack.c.bf16 %v661_v33, %v661_v33  ;;  %v1447_v33 = vld [vmem:[%s1859_s6 + $0x8] sm:$0xff]  }
 0x4bb   : > { %v778_v39 = vpack.c.bf16 %v777_v38, %v777_v38 }
 0x4bc   : > { %1329 = vmatmul.mubr.msk.bf16.vlgmr.msra.gmra.mxu0 %vm375_vm2, %v662_v35  ;;  %v1236_v35 = vld [vmem:[%s1855_s2] ss:$0 sm:$0xff] }
 0x4bd   : > { %1339 = vmatpush3.bf16.msra.mxu0 %v785_v37  ;;  %1340 = vmatprep.mubr.msk.bf16.mxu0 %vm1536_vm1, %v1535_v8 }
 0x4be   : > { %1352 = vmatprep.subr.bf16.mxu0 %v1535_v8 }
 0x4c4   : > { %1341 = vmatmul.mubr.msk.bf16.vlgmr.msra.gmra.mxu0 %vm375_vm2, %v778_v39 }
 0x4c5   : > { %1356 = vmatprep.mubr.msk.bf16.mxu0 %vm1536_vm1, %v1535_v8  ;;  %1353 = vmatpush3.bf16.msra.mxu0 %v1439_v16 }
 0x4c6   : > { %1354 = vmatprep.subr.bf16.mxu0 %v1535_v8 }
 0x547   : > { %v477_v40 = vpop.f32.mrf.mxu0 }
 0x548   : > { %483 = vst.msk [vmem:[#allocation2] sm:$0xff] %vm375_vm2, %v477_v40 }
 0x549   : > { %v1306_v41 = vpop.f32.mrf.mxu0 }
 0x54b   : > { %v480_v42 = vpop.f32.mrf.mxu0 }
 0x54d   : > { %v1307_v43 = vpop.f32.mrf.mxu0 }
 0x551   : > { %v589_v44 = vpop.f32.mrf.mxu0 }
 0x552   : > { %596 = vrot.lane.b32.xlu0 %v589_v44, %s1548_s23 }
 0x553   : > { %v1318_v45 = vpop.f32.mrf.mxu0 }
 0x555   : > { %v592_v46 = vpop.f32.mrf.mxu0 }
 0x557   : > { %v1319_v47 = vpop.f32.mrf.mxu0 }
 0x57c   : > { %v705_v50 = vpop.f32.mrf.mxu0 }
 0x57d   : > { %712 = vrot.lane.b32.xlu1 %v705_v50, %s1549_s14 }
 0x57e   : > { %v1330_v51 = vpop.f32.mrf.mxu0 }
 0x580   : > { %v708_v52 = vpop.f32.mrf.mxu0 }
 0x582   : > { %v1331_v53 = vpop.f32.mrf.mxu0 }
 0x584   : > { %v821_v54 = vpop.f32.mrf.mxu0 }
 0x585   : > { %828 = vrot.lane.b32.xlu0 %v821_v54, %s1550_s15  ;;  %s1817_s15 = scalar_lea.hbm %s1860_s7, %s1251_s29 }
 0x586   : > { %v1342_v55 = vpop.f32.mrf.mxu0 }
 0x588   : > { %v824_v56 = vpop.f32.mrf.mxu0 }
 0x58a   : > { %v1343_v57 = vpop.f32.mrf.mxu0 }
 0x5c4   : > { %v597_v58 = vpop.permute.xlu0 %596 }
 0x5c5   : > { %600 = vst.msk [vmem:[#allocation2] sm:$0xff] %vm599_vm4, %v597_v58 }
 0x5ef   : > { %v713_v59 = vpop.permute.xlu1 %712 }
 0x5f0   : > { %716 = vst.msk [vmem:[#allocation2] sm:$0xff] %vm715_vm5, %v713_v59 }
 0x5f7   : > { %v829_v60 = vpop.permute.xlu0 %828 }
 0x5f8   : > { %832 = vst.msk [vmem:[#allocation2] sm:$0xff] %vm831_vm6, %v829_v60 }
 0x5ff   : > { %v833_v61 = vld [vmem:[#allocation2] sm:$0xff] }
 0x600   : > { %v834_v62 = vpack.c.bf16 %v833_v61, %v833_v61 }
 0x602   : > { %1349 = vmatmul.mubr.msk.bf16.vlgmr.msra.gmra.mxu1 %vm284_vm0, %v834_v62 }
 0x603   : > { %1376 = vmatprep.mubr.msk.bf16.mxu1 %vm1536_vm1, %v1535_v8  ;;  %1361 = vmatpush3.bf16.msra.mxu1 %v1441_v27 }
 0x604   : > { %1362 = vmatprep.subr.bf16.mxu1 %v1535_v8 }
 0x607   : > { %1363 = vmatpush3.bf16.msra.mxu1 %v1442_v28 }
 0x608   : > { %1364 = vmatprep.subr.bf16.mxu1 %v1535_v8 }
 0x60b   : > { %1365 = vmatpush3.bf16.msra.mxu1 %v1443_v29 }
 0x60c   : > { %1366 = vmatprep.subr.bf16.mxu1 %v1535_v8 }
 0x60f   : > { %1367 = vmatpush3.bf16.msra.mxu1 %v1444_v30 }
 0x610   : > { %1368 = vmatprep.subr.bf16.mxu1 %v1535_v8 }
 0x613   : > { %1369 = vmatpush3.bf16.msra.mxu1 %v1445_v31 }
 0x614   : > { %1370 = vmatprep.subr.bf16.mxu1 %v1535_v8 }
 0x617   : > { %1371 = vmatpush3.bf16.msra.mxu1 %v1446_v32 }
 0x618   : > { %1372 = vmatprep.subr.bf16.mxu1 %v1535_v8 }
 0x61b   : > { %1373 = vmatpush3.bf16.msra.mxu1 %v1447_v33 }
 0x61c   : > { %1374 = vmatprep.subr.bf16.mxu1 %v1535_v8 }
 0x61f   : > { %1375 = vmatpush3.bf16.msra.mxu1 %v1448_v34 }
 0x6c2   : > { %v892_v2 = vpop.f32.mrf.mxu1 }
 0x6c3   : > { %v893_v3 = vadd.f32 %v1229_v63, %v892_v2 }
 0x6c4   : > { %v1350_v4 = vpop.f32.mrf.mxu1 }
 0x6c5   : > { %v902_v5 = vmul.f32 %v1233_v1, %v893_v3  ;;  %v1240_v3 = vld [vmem:[%s1854_s1 + $0x6] ss:$0 sm:$0xff]  ;;  %v1249_v4 = vld [vmem:[%s1854_s1 + $0x7] ss:$0 sm:$0xff] }
 0x6c6   : > { %v895_v6 = vpop.f32.mrf.mxu1 }
 0x6c7   : > { %v1751_v7 = vadd.f32 %v902_v5, %v1645_v0  ;;  %v1440_v0 = vld [vmem:[%s1858_s5] sm:$0xff]  }
 0x6c8   : > { %v1351_v9 = vpop.f32.mrf.mxu1  ;;  %1355 = vmatpush3.bf16.msra.mxu0 %v1440_v0 }
 0x6c9   : > { %v904_v10 = vsel %vm284_vm0, %v1751_v7, 0.0 }
 0x6ca   : > { %905 = vadd.xlane.f32.xlu1 %v904_v10 }
 0x753   : > { %v906_v11 = vpop.xlane.xlu1 %905 }
 0x754   : > { %v907_v12 = vmul.f32 0.03125, %v906_v11 }
 0x756   : > { %v908_v13 = vsub.f32 %v1751_v7, %v907_v12 }
 0x758   : > { %v909_v14 = vmul.f32 %v908_v13, %v908_v13 }
 0x75a   : > { %v910_v15 = vsel %vm284_vm0, %v909_v14, 0.0 }
 0x75b   : > { %911 = vadd.xlane.f32.xlu0 %v910_v15 }
 0x7e4   : > { %v912_v17 = vpop.xlane.xlu0 %911 }
 0x7e5   : > { %v913_v18 = vmul.f32 0.03125, %v912_v17 }
 0x7e7   : > { %v914_v19 = vadd.f32 1e-05, %v913_v18 }
 0x7e9   : > { %1467 = vrsqrt.f32 %v914_v19 }
 0x7f6   : > { %v1468_v20 = vpop.eup %1467 }
 0x7f7   : > { %v916_v23 = vmul.f32 %v1468_v20, %v908_v13 }
 0x7f9   : > { %v921_v25 = vmul.f32 %v1234_v21, %v916_v23 }
 0x7fb   : > { %v926_v22 = vadd.f32 %v1235_v24, %v921_v25 }
 0x7fd   : > { %v927_v26 = vpack.c.bf16 %v926_v22, %v926_v22 }
 0x7ff   : > { %1357 = vmatmul.mubr.msk.bf16.vlgmr.msra.gmra.mxu0 %vm284_vm0, %v927_v26 }
 0x8bf   : > { %v988_v36 = vpop.f32.mrf.mxu0 }
 0x8c0   : > { %v989_v37 = vadd.f32 %v1236_v35, %v988_v36 }
 0x8c1   : > { %v1358_v38 = vpop.f32.mrf.mxu0 }
 0x8c2   : > { %v995_v39 = vmul.f32 0.70710677, %v989_v37  ;;  %v994_v62 = vmul.f32 0.5, %v989_v37 }
 0x8c3   : > { %v991_v40 = vpop.f32.mrf.mxu0 }
 0x8c4   : > { %v996_v41 = vand.u32 2147483647, %v995_v39  ;;  %vm1016_vm7 = vcmp.ge.f32.partialorder %v995_v39, 0.0 }
 0x8c5   : > { %v1359_v42 = vpop.f32.mrf.mxu0 }
 0x8c6   : > { %v997_v43 = vmul.f32 0.3275911, %v996_v41  ;;  %v1010_v8 = vsub.f32 0.0, %v996_v41 }
 0x8c8   : > { %v998_v44 = vadd.f32 1.0, %v997_v43  ;;  %v1011_v45 = vmul.f32 %v1010_v8, %v996_v41 }
 0x8ca   : > { %1469 = vrcp.f32 %v998_v44  ;;  %v1012_v48 = vmul.f32 1.442695, %v1011_v45 }
 0x8cc   : > { %1471 = vpow2.f32 %v1012_v48 }
 0x8d7   : > { %v1470_v46 = vpop.eup %1469 }
 0x8d8   : > { %v1001_v47 = vmul.f32 1.0614054, %v1470_v46 }
 0x8d9   : > { %v1472_v57 = vpop.eup %1471 }
 0x8da   : > { %v1002_v49 = vadd.f32 -1.4531521, %v1001_v47 }
 0x8dc   : > { %v1003_v50 = vmul.f32 %v1470_v46, %v1002_v49 }
 0x8de   : > { %v1004_v51 = vadd.f32 1.4214138, %v1003_v50 }
 0x8e0   : > { %v1005_v52 = vmul.f32 %v1470_v46, %v1004_v51 }
 0x8e2   : > { %v1006_v53 = vadd.f32 -0.28449672, %v1005_v52 }
 0x8e4   : > { %v1007_v54 = vmul.f32 %v1470_v46, %v1006_v53 }
 0x8e6   : > { %v1008_v55 = vadd.f32 0.2548296, %v1007_v54 }
 0x8e8   : > { %v1009_v56 = vmul.f32 %v1470_v46, %v1008_v55 }
 0x8ea   : > { %v1014_v58 = vmul.f32 %v1472_v57, %v1009_v56 }
 0x8ec   : > { %v1015_v59 = vsub.f32 1.0, %v1014_v58 }
 0x8ee   : > { %v1017_v60 = vsub.f32 0.0, %v1015_v59 }
 0x8f0   : > { %v1018_v61 = vsel %vm1016_vm7, %v1015_v59, %v1017_v60 }
 0x8f1   : > { %v1019_v63 = vadd.f32 1.0, %v1018_v61 }
 0x8f3   : > { %v1020_v1 = vmul.f32 %v1019_v63, %v994_v62 }
 0x8f5   : > { %v1021_v2 = vpack.c.bf16 %v1020_v1, %v1020_v1 }
 0x8f7   : > { %1377 = vmatmul.mubr.bf16.vlgmr.msra.gmra.mxu1 %v1021_v2 }
 0x9b7   : > { %v1124_v5 = vpop.f32.mrf.mxu1 }
 0x9b8   : > { %v1125_v6 = vadd.f32 %v1240_v3, %v1124_v5 }
 0x9b9   : > { %v1378_v9 = vpop.f32.mrf.mxu1 }
 0x9ba   : > { %v1134_v10 = vmul.f32 %v1249_v4, %v1125_v6 }
 0x9bb   : > { %v1127_v11 = vpop.f32.mrf.mxu1 }
 0x9bc   : > { %v1135_v12 = vadd.f32 %v1134_v10, %v1751_v7 }
 0x9bd   : > { %v1379_v13 = vpop.f32.mrf.mxu1 }
 0x9be   : > { %1136 = vst.msk [vmem:[%s269_s8] sm:$0xff] %vm284_vm0, %v1135_v12 }
 0x9bf   : > { %1486 = shalt.err (!%p1483_p3)
}
 0x9c0   : > { %s1487_s21 = scalar_lea.hbm %s1817_s15, 128  ;;  %s1491_s23 = scalar_lea.hbm %s1860_s7, 256 }
 0x9c1   : > { %p1488_p4 = scmp.ne.s32.totalorder %s1817_s15, %s1487_s21  ;;  %p1492_p9 = scmp.lt.s32.totalorder %s1817_s15, %s1860_s7 }
 0x9c2   : > { %p1493_p10 = scmp.lt.s32.totalorder %s1491_s23, %s1487_s21 }
 0x9c3   : > { %p1489_p7 = pnand %p1488_p4, %p1630_p5 }
 0x9c4   : > { %p1494_p11 = por %p1493_p10, %p1492_p9 }
 0x9c5   : > { %p1490_p8 = pneg %p1489_p7 }
 0x9c7   : > { %p1495_p12 = pnand %p1494_p11, %p1490_p8 }
 0x9c9   : > { %1498 = shalt.err (!%p1495_p12)
}
 0x9ca   : > { %1380 = dma.vmem_to_hbm [thread:$0]  (%p1630_p5), %s1152_s9, 128, %s1817_s15, %s1138_s16  }
 0x9cb PF: > { %p1386_p13 = scmp.ge.s32.totalorder %s1533_s27, 2  ;;  %s1163_s13 = sand.u32 1, %s1521_s24  }
 0x9cc   : > { %s1164_s14 = scalar_lea.sflag [#allocation4], %s1163_s13 }
 0x9cd   : > { %p1383_p0 = pnand %p1386_p13, %p1634_p6 }
 0x9cf   : > { %p1384_p1 = pneg %p1383_p0 }
 0x9d1   : > { %1516 = dma.done.wait (%p1384_p1), %s1164_s14, 128  }
 0x9d2   : > { %1518 = vsyncadd (%p1384_p1), %s1164_s14, 4294967168  ;;  %p17_p2 = scmp.ge.s32.totalorder %s1617_s30, 4   ;;  %s1863_s24 = smov %s1525_s25 }
 0x9d3   : > { %s1864_s25 = smov %s1529_s26  ;;  %s1865_s26 = smov %s1628_s10 }
 0x9d4   : > { %s1866_s27 = smov %s1617_s30  ;;  %19 = sbr.rel (!%p17_p2) target bundleno = 3 (0x3), region = 83 }
 0x9d9   :  { %1169 = vsyncpa [#allocation4], 1 }
 0x9da   :  { %1171 = vsyncpa [#allocation4 + $0x1], 1 }

</bundles_post_ra>
